<compile_context>
chip_gen: v5e
topology: v5e:2x2
jax: 0.10.0
libtpu: 0.0.40
codegen_flags: <defaults>
</compile_context>

<pallas_src>
import functools
import math

import jax
import jax.numpy as jnp
import numpy as np
from jax import lax
from jax.experimental import pallas as pl
from jax.experimental.pallas import tpu as pltpu


def _round_up(x: int, m: int) -> int:
    return ((x + m - 1) // m) * m


# ----------------------------------------------------------------------------
# Pallas kernel: binary adjacency for one scale (one row-tile per grid step)
# ----------------------------------------------------------------------------
def _make_adj_kernel(alpha: float, h_actual: int, h_pad: int):
    def kernel(node_ref, hyper_ref, adj_ref):
        # node_ref : (TILE_N, D)     bf16
        # hyper_ref: (D, H_pad)      bf16 (columns >= h_actual are zero pad)
        # adj_ref  : (TILE_N, H_pad) int8
        a = jnp.dot(node_ref[...], hyper_ref[...],
                    preferred_element_type=jnp.float32)        # MXU, f32 acc
        logits = jnp.maximum(alpha * a, 0.0)                   # relu(alpha*a)

        # Padded hyperedge columns give logits == 0 and every valid logit is
        # >= 0 (relu), so the row max is unaffected by the padding.
        m = jnp.max(logits, axis=1, keepdims=True)
        e = jnp.exp(logits - m)                                 # EUP
        if h_actual != h_pad:
            col = lax.broadcasted_iota(jnp.int32, logits.shape, 1)
            e = jnp.where(col < h_actual, e, 0.0)
        s = jnp.sum(e, axis=1, keepdims=True)

        # softmax_ij > 0.5  <=>  e_ij > 0.5 * s_i.  At most one entry per row
        # can satisfy this and it is always inside the top-k (k >= 1), so this
        # single compare equals the reference's topk-mask + (>0.5) threshold.
        adj_ref[...] = (e > 0.5 * s).astype(jnp.int8)

    return kernel


@functools.partial(jax.jit, static_argnames=("alpha",))
def compute_binary_adjacency(node_emb, hyper_emb, *, alpha):
    """(N, D) x (H, D) -> (N, H) int8 binary node-to-hyperedge adjacency."""
    n, d = node_emb.shape
    h, _ = hyper_emb.shape

    # lane-dense output: pad hyperedge axis to a multiple of 128
    h_pad = _round_up(max(h, 1), 128)
    # sublane-friendly row tiling (multiples of 32 keep int8 stores unmasked)
    if n <= 1024:
        tile_n = _round_up(n, 32)
        n_pad = tile_n
    else:
        tile_n = 512
        n_pad = _round_up(n, tile_n)
    grid_n = n_pad // tile_n

    node_p = jnp.pad(node_emb.astype(jnp.bfloat16), ((0, n_pad - n), (0, 0)))
    hyper_t = jnp.pad(hyper_emb.astype(jnp.bfloat16).T,
                      ((0, 0), (0, h_pad - h)))                 # (D, H_pad)

    adj_pad = pl.pallas_call(
        _make_adj_kernel(float(alpha), int(h), int(h_pad)),
        out_shape=jax.ShapeDtypeStruct((n_pad, h_pad), jnp.int8),
        grid=(grid_n,),
        in_specs=[
            pl.BlockSpec((tile_n, d), lambda i: (i, 0)),        # node row tile
            pl.BlockSpec((d, h_pad), lambda i: (0, 0)),         # resident table
        ],
        out_specs=pl.BlockSpec((tile_n, h_pad), lambda i: (i, 0)),
        compiler_params=pltpu.CompilerParams(
            dimension_semantics=("parallel",),
        ),
    )(node_p, hyper_t)

    return adj_pad[:n, :h]


# ----------------------------------------------------------------------------
# Module wrapper
# ----------------------------------------------------------------------------
class MultiAdaptiveHypergraph:
    def __init__(self, seq_len, window_size, d_model, hyper_num, k, key):
        self.seq_len = seq_len
        self.window_size = window_size
        self.dim = d_model
        self.hyper_num = hyper_num
        self.alpha = 3.0
        self.k = k

        # deterministic parameter init (nn.Embedding default: N(0, 1)),
        # stored in bf16 (halves DMA bytes, native-bf16 MXU matmul).
        self.embedhy = []
        self.embednod = []
        for i in range(len(self.hyper_num)):
            key, k1, k2 = jax.random.split(key, 3)
            self.embedhy.append(
                jax.random.normal(k1, (self.hyper_num[i], self.dim),
                                  jnp.float32).astype(jnp.bfloat16))
            if i == 0:
                node_rows = self.seq_len
            else:
                product = math.prod(self.window_size[:i])
                node_rows = int(math.floor(self.seq_len / product))
            self.embednod.append(
                jax.random.normal(k2, (node_rows, self.dim),
                                  jnp.float32).astype(jnp.bfloat16))
        # NOTE: linhy / linnod / dropout exist in __init__ but are unused in forward.

    def forward(self, x):
        # node counts per scale (same recurrence as the PyTorch forward)
        node_num = [self.seq_len]
        for i in range(len(self.window_size)):
            node_num.append(int(math.floor(node_num[i] / self.window_size[i])))

        # 1) launch all per-scale kernels (async), no host sync inside the loop
        adj_dev = []
        for i in range(len(self.hyper_num)):
            nodeec = self.embednod[i][: node_num[i], :]   # (N_i, D)
            hyperen = self.embedhy[i]                     # (H_i, D)
            if self.k < 1 or hyperen.shape[0] == 0:
                # empty top-k (or no hyperedges) -> all-zero adjacency
                adj_dev.append(jnp.zeros((nodeec.shape[0], hyperen.shape[0]),
                                         jnp.int8))
            else:
                adj_dev.append(compute_binary_adjacency(
                    nodeec, hyperen, alpha=self.alpha))

        # 2) single batched device->host transfer
        adj_host = jax.device_get(adj_dev)

        # 3) TODO(synk): the ragged conversion below has data-dependent output
        # shapes, so it has no static-shape Pallas equivalent; it mirrors the
        # PyTorch post-processing exactly on host (vectorized).
        hyperedge_all = []
        for adj_np in adj_host:
            adj_np = np.asarray(adj_np)
            # keep non-empty hyperedge columns (renumbered 0..C-1, as in ref)
            sub = adj_np[:, adj_np.any(axis=0)] if adj_np.size else adj_np
            # column-major traversal == per-column row lists concatenated
            edge_idx, node_idx = (np.nonzero(sub.T)
                                  if sub.size else (np.zeros(0, np.int64),) * 2)
            hypergraph = np.vstack((node_idx.astype(np.int64),
                                    edge_idx.astype(np.int64)))
            hyperedge_all.append(hypergraph)
        return hyperedge_all


# ----------------------------------------------------------------------------
# Demo
# ----------------------------------------------------------------------------
if __name__ == "__main__":
    # small config consistent with the module
    seq_len = 16
    window_size = [2, 2]
    d_model = 32
    hyper_num = [8, 6, 4]
    k = 3
    batch = 2

    key = jax.random.PRNGKey(0)
    key, xkey, pkey = jax.random.split(key, 3)

    # x: (batch, seq_len, d_model); only used for device placement in the
    # original forward, values do not affect the result.
    x = jax.random.normal(xkey, (batch, seq_len, d_model), jnp.float32)

    model = MultiAdaptiveHypergraph(seq_len, window_size, d_model,
                                    hyper_num, k, pkey)

    # Run the kernels once and block on the device results.
    node_num = [seq_len]
    for i in range(len(window_size)):
        node_num.append(int(math.floor(node_num[i] / window_size[i])))
    adj_mats = []
    for i in range(len(hyper_num)):
        adj = compute_binary_adjacency(model.embednod[i][: node_num[i], :],
                                       model.embedhy[i], alpha=model.alpha)
        adj_mats.append(adj)
    for adj in adj_mats:
        jax.block_until_ready(adj)

    # Sanity: every row of each binary adjacency has at most one selected edge
    # (softmax > 0.5 can hold for at most one entry per row).
    for adj in adj_mats:
        assert int(np.asarray(adj).sum(axis=1).max(initial=0)) <= 1

    # Full forward (kernel + host ragged post-processing), mirrors PyTorch output.
    hyperedge_all = model.forward(x)
    assert len(hyperedge_all) == len(hyper_num)
    for hg in hyperedge_all:
        assert hg.shape[0] == 2

    print("KERNEL_OK")
</pallas_src>

<mosaic_0001>
module attributes {stable_mosaic.version = 11 : i64} {
  func.func @kernel(%arg0: i32, %arg1: memref<32x32xbf16, #tpu.memory_space<vmem>>, %arg2: memref<32x128xbf16, #tpu.memory_space<vmem>>, %arg3: memref<32x128xi8, #tpu.memory_space<vmem>>) attributes {dimension_semantics = [#tpu.dimension_semantics<parallel>], iteration_bounds = array<i64: 1>, scalar_prefetch = 0 : i64, scratch_operands = 0 : i64, tpu.core_type = #tpu.core_type<tc>, window_params = [{transform_indices = @transform_0, window_bounds = array<i64: 32, 32>}, {pipeline_mode = #tpu.pipeline_mode<synchronous>, transform_indices = @transform_1, window_bounds = array<i64: 32, 128>}, {transform_indices = @transform_2, window_bounds = array<i64: 32, 128>}]} {
    %c0 = arith.constant 0 : index
    %c0_0 = arith.constant 0 : index
    %0 = vector.load %arg1[%c0, %c0_0] : memref<32x32xbf16, #tpu.memory_space<vmem>>, vector<32x32xbf16>
    %c0_1 = arith.constant 0 : index
    %c0_2 = arith.constant 0 : index
    %1 = vector.load %arg2[%c0_1, %c0_2] : memref<32x128xbf16, #tpu.memory_space<vmem>>, vector<32x128xbf16>
    %cst = arith.constant dense<0.000000e+00> : vector<32x128xf32>
    %2 = tpu.matmul %0, %1, %cst {dimension_numbers = #tpu.dot_dimension_numbers<[1], [0], [0], [1], [0, 0, 1, 1], [], []>} : vector<32x32xbf16>, vector<32x128xbf16>, vector<32x128xf32> -> vector<32x128xf32>
    %cst_3 = arith.constant 3.000000e+00 : f32
    %3 = vector.broadcast %cst_3 : f32 to vector<32x128xf32>
    %4 = arith.mulf %3, %2 : vector<32x128xf32>
    %cst_4 = arith.constant 0.000000e+00 : f32
    %5 = vector.broadcast %cst_4 : f32 to vector<32x128xf32>
    %6 = arith.maximumf %4, %5 : vector<32x128xf32>
    %cst_5 = arith.constant dense<0xFF800000> : vector<32xf32>
    %7 = vector.multi_reduction <maximumf>, %6, %cst_5 [1] : vector<32x128xf32> to vector<32xf32>
    %8 = vector.shape_cast %7 : vector<32xf32> to vector<32x1xf32>
    %9 = vector.broadcast %8 : vector<32x1xf32> to vector<32x128xf32>
    %10 = arith.subf %6, %9 : vector<32x128xf32>
    %11 = math.exp %10 : vector<32x128xf32>
    %12 = tpu.iota {dimensions = array<i32: 1>} : vector<32x128xi32>
    %c8_i32 = arith.constant 8 : i32
    %13 = vector.broadcast %c8_i32 : i32 to vector<32x128xi32>
    %14 = arith.cmpi slt, %12, %13 : vector<32x128xi32>
    %cst_6 = arith.constant 0.000000e+00 : f32
    %15 = vector.broadcast %cst_6 : f32 to vector<32x128xf32>
    %16 = arith.select %14, %11, %15 : vector<32x128xi1>, vector<32x128xf32>
    %cst_7 = arith.constant dense<0.000000e+00> : vector<32xf32>
    %17 = vector.multi_reduction <add>, %16, %cst_7 [1] : vector<32x128xf32> to vector<32xf32>
    %18 = vector.shape_cast %17 : vector<32xf32> to vector<32x1xf32>
    %cst_8 = arith.constant 5.000000e-01 : f32
    %19 = vector.broadcast %cst_8 : f32 to vector<32x1xf32>
    %20 = arith.mulf %19, %18 : vector<32x1xf32>
    %21 = vector.broadcast %20 : vector<32x1xf32> to vector<32x128xf32>
    %22 = arith.cmpf ogt, %16, %21 : vector<32x128xf32>
    %23 = arith.extui %22 : vector<32x128xi1> to vector<32x128xi8>
    %c0_9 = arith.constant 0 : index
    %c0_10 = arith.constant 0 : index
    %24 = vector.load %arg3[%c0_9, %c0_10] : memref<32x128xi8, #tpu.memory_space<vmem>>, vector<32x128xi8>
    tpu.vector_store %arg3[%c0_9, %c0_10], %23 {strides = array<i32>} : memref<32x128xi8, #tpu.memory_space<vmem>>, vector<32x128xi8>,
    return
  }
  func.func @transform_0(%arg0: i32) -> (i32, i32) {
    %c0_i32 = arith.constant 0 : i32
    %c0_i32_0 = arith.constant 0 : i32
    return %arg0, %c0_i32 : i32, i32
  }
  func.func @transform_1(%arg0: i32) -> (i32, i32) {
    %c0_i32 = arith.constant 0 : i32
    %c0_i32_0 = arith.constant 0 : i32
    %c0_i32_1 = arith.constant 0 : i32
    return %c0_i32, %c0_i32_0 : i32, i32
  }
  func.func @transform_2(%arg0: i32) -> (i32, i32) {
    %c0_i32 = arith.constant 0 : i32
    %c0_i32_0 = arith.constant 0 : i32
    return %arg0, %c0_i32 : i32, i32
  }
}

</mosaic_0001>

<bundles_post_ra>
// kernel: compute_binary_adjacency.1
= control target key start
LH: loop header
LB: loop body
LE: loop exit
PB: predicated region body
PF: predicated region fallthrough
CT: control target
= control target key end

     0   :  { %vm44_vm0 = vcmask 261120   ;;  %v98_v20 = vlaneseq  ;;  %v181_v46 = vmov 0   ;;  %s221_s1 = inlined_call_operand.vmem [shape: bf16[32,128], index: 1, kind: input, shape index: {}]   ;;  %s222_s0 = inlined_call_operand.vmem [shape: bf16[32,32], index: 0, kind: input, shape index: {}]   ;;  %s223_s2 = inlined_call_operand.vmem [shape: s8[32,128], index: 2, kind: output, shape index: {}]  }
   0x1   :  { %v169_v0 = vld [vmem:[%s221_s1 + $0x8] sm:$0xff]  ;;  %v168_v1 = vld [vmem:[%s221_s1] sm:$0xff] }
   0x2   :  { %57 = vmatpush.bf16.msra.mxu0 %v169_v0  ;;  %170 = vmatpush.bf16.msra.mxu1 %v169_v0  ;;  %v166_v2 = vld [vmem:[%s222_s0] sm:$0xff]  ;;  %v167_v3 = vld [vmem:[%s222_s0 + $0x8] sm:$0xff]  ;;  %v99_v23 = vand.u32 127, %v98_v20 }
   0x4   :  { %vm100_vm1 = vcmp.lt.s32.totalorder %v99_v23, 8 }
   0x6   :  { %58 = vmatpush.bf16.msra.mxu0 %v168_v1  ;;  %171 = vmatpush.bf16.msra.mxu1 %v168_v1 }
   0x9   :  { %164 = vmatmul.msk.bf16.vlgmr.msra.gmra.mxu0 %vm44_vm0, %v166_v2  ;;  %165 = vmatmul.msk.bf16.vlgmr.msra.gmra.mxu1 %vm44_vm0, %v167_v3 }
  0x86   :  { %v60_v4 = vpop.f32.mrf.mxu0  ;;  %v65_v5 = vpop.f32.mrf.mxu1 }
  0x87   :  { %v70_v6 = vmul.f32 3.0, %v60_v4  ;;  %v72_v7 = vmul.f32 3.0, %v65_v5 }
  0x89   :  { %v74_v8 = vmax.f32 %v70_v6, 0.0  ;;  %v76_v9 = vmax.f32 %v72_v7, 0.0 }
  0x8b   :  { %82 = vmax.xlane.f32.xlu1 %v76_v9  ;;  %78 = vmax.xlane.f32.xlu0 %v74_v8 }
  0x8e   :  { %v62_v10 = vpop.f32.mrf.mxu0  ;;  %v67_v11 = vpop.f32.mrf.mxu1 }
  0x8f   :  { %v71_v12 = vmul.f32 3.0, %v62_v10  ;;  %v73_v13 = vmul.f32 3.0, %v67_v11 }
  0x91   :  { %v75_v14 = vmax.f32 %v71_v12, 0.0  ;;  %v77_v15 = vmax.f32 %v73_v13, 0.0 }
  0x93   :  { %84 = vmax.xlane.f32.xlu1 %v77_v15  ;;  %80 = vmax.xlane.f32.xlu0 %v75_v14 }
  0xfe   :  { %v83_v16 = vpop.xlane.xlu1 %82  ;;  %v79_v17 = vpop.xlane.xlu0 %78 }
  0xff   :  { %v88_v18 = vsub.f32 %v76_v9, %v83_v16  ;;  %v86_v19 = vsub.f32 %v74_v8, %v79_v17 }
 0x101   :  { %v94_v21 = vmul.f32 1.442695, %v88_v18  ;;  %v90_v22 = vmul.f32 1.442695, %v86_v19 }
 0x103   :  { %173 = vpow2.f32 %v94_v21 }
 0x104   :  { %175 = vpow2.f32 %v90_v22 }
 0x106   :  { %v85_v24 = vpop.xlane.xlu1 %84  ;;  %v81_v25 = vpop.xlane.xlu0 %80 }
 0x107   :  { %v89_v26 = vsub.f32 %v77_v15, %v85_v24  ;;  %v87_v27 = vsub.f32 %v75_v14, %v81_v25 }
 0x109   :  { %v174_v28 = vpop.eup %173  ;;  %v96_v29 = vmul.f32 1.442695, %v89_v26  ;;  %v92_v30 = vmul.f32 1.442695, %v87_v27 }
 0x10a   :  { %v176_v31 = vpop.eup %175  ;;  %v103_v32 = vsel %vm100_vm1, %v174_v28, 0.0 }
 0x10b   :  { %177 = vpow2.f32 %v96_v29  ;;  %v101_v33 = vsel %vm100_vm1, %v176_v31, 0.0  ;;  %109 = vadd.xlane.f32.xlu0 %v103_v32 }
 0x10c   :  { %179 = vpow2.f32 %v92_v30  ;;  %105 = vadd.xlane.f32.xlu2 %v101_v33 }
 0x111   :  { %v178_v34 = vpop.eup %177 }
 0x112   :  { %v180_v35 = vpop.eup %179  ;;  %v104_v36 = vsel %vm100_vm1, %v178_v34, 0.0 }
 0x113   :  { %111 = vadd.xlane.f32.xlu1 %v104_v36  ;;  %v102_v37 = vsel %vm100_vm1, %v180_v35, 0.0 }
 0x114   :  { %107 = vadd.xlane.f32.xlu2 %v102_v37 }
 0x17e   :  { %v110_v39 = vpop.xlane.xlu0 %109 }
 0x17f   :  { %v106_v38 = vpop.xlane.xlu2 %105  ;;  %v115_v40 = vmul.f32 0.5, %v110_v39 }
 0x180   :  { %v113_v41 = vmul.f32 0.5, %v106_v38 }
 0x181   :  { %vm119_vm2 = vcmp.gt.f32.partialorder %v103_v32, %v115_v40 }
 0x182   :  { %vm117_vm4 = vcmp.gt.f32.partialorder %v101_v33, %v113_v41 }
 0x186   :  { %v112_v42 = vpop.xlane.xlu1 %111 }
 0x187   :  { %v116_v43 = vmul.f32 0.5, %v112_v42  ;;  %v108_v44 = vpop.xlane.xlu2 %107 }
 0x188   :  { %v114_v45 = vmul.f32 0.5, %v108_v44 }
 0x189   :  { %vm120_vm3 = vcmp.gt.f32.partialorder %v104_v36, %v116_v43 }
 0x18a   :  { %vm122_vm5 = vmpackc.low %vm120_vm3, %vm119_vm2  ;;  %vm118_vm6 = vcmp.gt.f32.partialorder %v102_v37, %v114_v45 }
 0x18b   :  { %v124_v47 = vsel %vm122_vm5, 16711935, %v181_v46  ;;  %vm121_vm7 = vmpackc.low %vm118_vm6, %vm117_vm4 }
 0x18c   :  { %v123_v48 = vsel %vm121_vm7, 16711935, %v181_v46 }
 0x18d   :  { %v125_v49 = vpack.c.b8 %v124_v47, %v123_v48 }
 0x18f   :  { %vm126_vm8 = vnez %v125_v49 }
 0x190   :  { %v127_v50 = vsel %vm126_vm8, 16843009, %v181_v46 }
 0x191   :  { %v128_v51 = vunpack.c.0.s8 %v127_v50  ;;  %v129_v52 = vunpack.c.1.s8 %v127_v50  ;;  %v130_v53 = vunpack.c.2.s8 %v127_v50  ;;  %v131_v54 = vunpack.c.3.s8 %v127_v50 }
 0x193   :  { %v132_v55 = vpack.c.b16 %v128_v51, %v128_v51  ;;  %v134_v56 = vpack.c.b16 %v129_v52, %v129_v52  ;;  %v136_v57 = vpack.c.b16 %v130_v53, %v130_v53  ;;  %v138_v58 = vpack.c.b16 %v131_v54, %v131_v54 }
 0x195   :  { %v133_v59 = vpack.c.b8 %v132_v55, %v132_v55  ;;  %v135_v60 = vpack.c.b8 %v134_v56, %v134_v56  ;;  %v137_v61 = vpack.c.b8 %v136_v57, %v136_v57  ;;  %v139_v62 = vpack.c.b8 %v138_v58, %v138_v58 }
 0x197   :  { %140 = vst [vmem:[%s223_s2] sm:$0x3] %v133_v59 }
 0x198   :  { %141 = vst [vmem:[%s223_s2 + $0x2] sm:$0x3] %v135_v60 }
 0x199   :  { %142 = vst [vmem:[%s223_s2 + $0x4] sm:$0x3] %v137_v61 }
 0x19a   :  { %143 = vst [vmem:[%s223_s2 + $0x6] sm:$0x3] %v139_v62 }

</bundles_post_ra>
